<compile_context>
chip_gen: v6e
topology: v6e:2x2x1
jax: 0.10.0
libtpu: 0.0.40
codegen_flags: <defaults>
</compile_context>

<pallas_src>
import jax
import jax.numpy as jnp
from jax.experimental import pallas as pl
from jax.experimental.pallas import tpu as pltpu

LANE = 128


def _round_up(n, m):
    return ((n + m - 1) // m) * m


# ----------------------------------------------------------------------------
# Kernels
# ----------------------------------------------------------------------------
def _m1_fused_kernel(x_ref, w1_ref, b1_ref, wf_ref, bf_ref, wc2_ref, bc2_ref, y_ref):
    """y = relu(relu(X@W1+b1) @ Wfused + bfused) @ Wc2 + bc2  (mu folded into cls L1)."""
    x = x_ref[...].astype(w1_ref.dtype)                       # in-kernel bf16 cast
    h = jnp.dot(x, w1_ref[...], preferred_element_type=jnp.float32) + b1_ref[...]
    h = jnp.maximum(h, 0.0)
    hc = jnp.dot(h.astype(wf_ref.dtype), wf_ref[...],
                 preferred_element_type=jnp.float32) + bf_ref[...]
    hc = jnp.maximum(hc, 0.0)
    y = jnp.dot(hc.astype(wc2_ref.dtype), wc2_ref[...],
                preferred_element_type=jnp.float32) + bc2_ref[...]
    y_ref[...] = y.astype(y_ref.dtype)


def _m1_unfused_kernel(x_ref, w1_ref, b1_ref, wmu_ref, bmu_ref,
                       wc1_ref, bc1_ref, wc2_ref, bc2_ref, y_ref):
    """Un-fused variant (mu materialized).  Preferred on v5e at real M1 dims."""
    x = x_ref[...].astype(w1_ref.dtype)
    h = jnp.dot(x, w1_ref[...], preferred_element_type=jnp.float32) + b1_ref[...]
    h = jnp.maximum(h, 0.0)
    mu = jnp.dot(h.astype(wmu_ref.dtype), wmu_ref[...],
                 preferred_element_type=jnp.float32) + bmu_ref[...]
    hc = jnp.dot(mu.astype(wc1_ref.dtype), wc1_ref[...],
                 preferred_element_type=jnp.float32) + bc1_ref[...]
    hc = jnp.maximum(hc, 0.0)
    y = jnp.dot(hc.astype(wc2_ref.dtype), wc2_ref[...],
                preferred_element_type=jnp.float32) + bc2_ref[...]
    y_ref[...] = y.astype(y_ref.dtype)


# ----------------------------------------------------------------------------
# One-time parameter preparation (fold, pad, cast) -- hoisted out of the call path.
# ----------------------------------------------------------------------------
def prepare_m1_params(params, *, use_bf16=True, fold_mu=True, pad_to=LANE):
    """Fold the (affine) mu head, zero-pad hidden dims to lane multiples, cast weights.

    All exact: the fold is done in f32 before any bf16 cast; padded weight
    columns/rows and padded biases are zero, so they never contaminate valid lanes.
    """
    (w1, b1, wmu, bmu, wsig, bsig, wc1, bc1, wc2, bc2) = [
        jnp.asarray(p, jnp.float32) for p in params]
    del wsig, bsig                       # dead on the sampling=False output path

    n_classes = wc2.shape[1]
    h_enc, z_dim, h_cls = w1.shape[1], wmu.shape[1], wc1.shape[1]
    rup = (lambda n: _round_up(n, pad_to)) if pad_to else (lambda n: n)
    he_p, z_p, hc_p, nc_p = rup(h_enc), rup(z_dim), rup(h_cls), rup(n_classes)

    def pad2(a, rows, cols):
        return jnp.pad(a, ((0, rows - a.shape[0]), (0, cols - a.shape[1])))

    w1p = pad2(w1, w1.shape[0], he_p)    # d_in left unpadded: X streams as-is
    b1p = pad2(b1, 1, he_p)
    wc2p = pad2(wc2, hc_p, nc_p)
    bc2p = pad2(bc2, 1, nc_p)

    if fold_mu:
        w_fused = wmu @ wc1              # (h_enc, h_cls), exact f32 fold
        b_fused = bmu @ wc1 + bc1        # (1, h_cls)
        weights = (w1p, b1p, pad2(w_fused, he_p, hc_p), pad2(b_fused, 1, hc_p),
                   wc2p, bc2p)
    else:
        weights = (w1p, b1p,
                   pad2(wmu, he_p, z_p), pad2(bmu, 1, z_p),
                   pad2(wc1, z_p, hc_p), pad2(bc1, 1, hc_p),
                   wc2p, bc2p)

    mxu_dtype = jnp.bfloat16 if use_bf16 else jnp.float32
    prepped = tuple(
        a.astype(jnp.float32) if a.shape[0] == 1 else a.astype(mxu_dtype)
        for a in weights)                # biases stay f32 (added to f32 accumulators)

    return dict(weights=prepped, fold_mu=fold_mu, n_classes=n_classes, n_pad=nc_p)


# ----------------------------------------------------------------------------
# Forward
# ----------------------------------------------------------------------------
def m1_forward(x, prepared, *, block_b=512, out_dtype=jnp.float32):
    """Fused M1 forward (sampling=False). x: (B, d_in) f32 -> logits (B, n_classes)."""
    B, d_in = x.shape
    weights = prepared["weights"]
    n_pad = prepared["n_pad"]
    n_classes = prepared["n_classes"]

    # Batch tile: as large as block_b allows (per-grid-step overhead dominates),
    # capped so grid_n >= 2 (keeps v7x's second TensorCore busy), multiple of 16
    # (clean bf16 sublane packing).  Ragged last block is masked by Pallas.
    tb = max(16, min(block_b, _round_up(pl.cdiv(B, 2), 16)))
    grid_n = pl.cdiv(B, tb)

    kernel = _m1_fused_kernel if prepared["fold_mu"] else _m1_unfused_kernel

    in_specs = [pl.BlockSpec((tb, d_in), lambda i: (i, 0))]          # X tile (pipelined)
    for w in weights:                                                 # weights: VMEM-resident
        in_specs.append(pl.BlockSpec(w.shape, lambda i: (0, 0)))
    out_spec = pl.BlockSpec((tb, n_pad), lambda i: (i, 0))            # lane-dense stores

    y_padded = pl.pallas_call(
        kernel,
        out_shape=jax.ShapeDtypeStruct((B, n_pad), out_dtype),
        grid=(grid_n,),
        in_specs=in_specs,
        out_specs=out_spec,
        compiler_params=pltpu.CompilerParams(
            dimension_semantics=("parallel",)),   # megacore batch sharding on v7x
    )(x, *weights)

    return y_padded[:, :n_classes]


# ----------------------------------------------------------------------------
# Reference + demo
# ----------------------------------------------------------------------------
def init_params(key, d_in, h_enc, z_dim, h_cls, n_classes):
    ks = jax.random.split(key, 5)

    def dense(kw, fan_in, fan_out):
        scale = 1.0 / jnp.sqrt(fan_in)
        w = jax.random.uniform(kw, (fan_in, fan_out), jnp.float32, -scale, scale)
        b = jnp.zeros((1, fan_out), jnp.float32)
        return w, b

    w1, b1 = dense(ks[0], d_in, h_enc)
    wmu, bmu = dense(ks[1], h_enc, z_dim)
    wsig, bsig = dense(ks[2], h_enc, z_dim)    # encoder has it; unused when sampling=False
    wc1, bc1 = dense(ks[3], z_dim, h_cls)
    wc2, bc2 = dense(ks[4], h_cls, n_classes)
    return (w1, b1, wmu, bmu, wsig, bsig, wc1, bc1, wc2, bc2)


def m1_reference(x, params):
    """Plain-JAX (f32, un-fused) reference matching M1.forward with sampling=False."""
    (w1, b1, wmu, bmu, wsig, bsig, wc1, bc1, wc2, bc2) = params
    h = jnp.maximum(x @ w1 + b1, 0.0)
    mu = h @ wmu + bmu
    hc = jnp.maximum(mu @ wc1 + bc1, 0.0)
    return hc @ wc2 + bc2


if __name__ == "__main__":
    B, D_IN, H_ENC, Z_DIM, H_CLS, N_CLASSES = 24, 32, 64, 16, 32, 10

    key = jax.random.PRNGKey(0)
    kx, kp = jax.random.split(key)
    x = jax.random.normal(kx, (B, D_IN), jnp.float32)
    params = init_params(kp, D_IN, H_ENC, Z_DIM, H_CLS, N_CLASSES)

    y_ref = m1_reference(x, params)

    # f32 fused path (exercises: mu fold, lane padding, 2-step ragged batch grid).
    prep_f32 = prepare_m1_params(params, use_bf16=False, fold_mu=True)
    y32 = jax.block_until_ready(m1_forward(x, prep_f32))
    assert y32.shape == (B, N_CLASSES)
    assert jnp.allclose(y32, y_ref, atol=2e-3, rtol=2e-3), "f32 fused kernel mismatch"

    # f32 un-fused variant (v5e-friendly path).
    prep_unf = prepare_m1_params(params, use_bf16=False, fold_mu=False)
    yunf = jax.block_until_ready(m1_forward(x, prep_unf))
    assert yunf.shape == (B, N_CLASSES)
    assert jnp.allclose(yunf, y_ref, atol=2e-3, rtol=2e-3), "f32 un-fused kernel mismatch"

    # default bf16-MXU fused path (f32 accumulate / bias / relu) -> loose tolerance.
    prep_bf16 = prepare_m1_params(params, use_bf16=True, fold_mu=True)
    y16 = jax.block_until_ready(m1_forward(x, prep_bf16))
    assert y16.shape == (B, N_CLASSES)
    assert jnp.allclose(y16, y_ref, atol=1e-1, rtol=1e-1), "bf16 kernel mismatch"

    print("KERNEL_OK")
</pallas_src>

<mosaic_0001>
module attributes {stable_mosaic.version = 11 : i64} {
  func.func @_m1_fused_kernel(%arg0: i32, %arg1: memref<16x32xf32, #tpu.memory_space<vmem>>, %arg2: memref<32x128xf32, #tpu.memory_space<vmem>>, %arg3: memref<1x128xf32, #tpu.memory_space<vmem>>, %arg4: memref<128x128xf32, #tpu.memory_space<vmem>>, %arg5: memref<1x128xf32, #tpu.memory_space<vmem>>, %arg6: memref<128x128xf32, #tpu.memory_space<vmem>>, %arg7: memref<1x128xf32, #tpu.memory_space<vmem>>, %arg8: memref<16x128xf32, #tpu.memory_space<vmem>>) attributes {dimension_semantics = [#tpu.dimension_semantics<parallel>], iteration_bounds = array<i64: 2>, scalar_prefetch = 0 : i64, scratch_operands = 0 : i64, tpu.core_type = #tpu.core_type<tc>, window_params = [{transform_indices = @transform_0, window_bounds = array<i64: 16, 32>}, {pipeline_mode = #tpu.pipeline_mode<synchronous>, transform_indices = @transform_1, window_bounds = array<i64: 32, 128>}, {pipeline_mode = #tpu.pipeline_mode<synchronous>, transform_indices = @transform_2, window_bounds = array<i64: 1, 128>}, {pipeline_mode = #tpu.pipeline_mode<synchronous>, transform_indices = @transform_3, window_bounds = array<i64: 128, 128>}, {pipeline_mode = #tpu.pipeline_mode<synchronous>, transform_indices = @transform_4, window_bounds = array<i64: 1, 128>}, {pipeline_mode = #tpu.pipeline_mode<synchronous>, transform_indices = @transform_5, window_bounds = array<i64: 128, 128>}, {pipeline_mode = #tpu.pipeline_mode<synchronous>, transform_indices = @transform_6, window_bounds = array<i64: 1, 128>}, {transform_indices = @transform_7, window_bounds = array<i64: 16, 128>}]} {
    %c0 = arith.constant 0 : index
    %c0_0 = arith.constant 0 : index
    %0 = vector.load %arg1[%c0, %c0_0] : memref<16x32xf32, #tpu.memory_space<vmem>>, vector<16x32xf32>
    %c0_1 = arith.constant 0 : index
    %c0_2 = arith.constant 0 : index
    %1 = vector.load %arg2[%c0_1, %c0_2] : memref<32x128xf32, #tpu.memory_space<vmem>>, vector<32x128xf32>
    %cst = arith.constant dense<0.000000e+00> : vector<16x128xf32>
    %2 = tpu.matmul %0, %1, %cst {dimension_numbers = #tpu.dot_dimension_numbers<[1], [0], [0], [1], [0, 0, 1, 1], [], []>} : vector<16x32xf32>, vector<32x128xf32>, vector<16x128xf32> -> vector<16x128xf32>
    %c0_3 = arith.constant 0 : index
    %c0_4 = arith.constant 0 : index
    %3 = vector.load %arg3[%c0_3, %c0_4] : memref<1x128xf32, #tpu.memory_space<vmem>>, vector<1x128xf32>
    %4 = vector.broadcast %3 : vector<1x128xf32> to vector<16x128xf32>
    %5 = arith.addf %2, %4 : vector<16x128xf32>
    %cst_5 = arith.constant 0.000000e+00 : f32
    %6 = vector.broadcast %cst_5 : f32 to vector<16x128xf32>
    %7 = arith.maximumf %5, %6 : vector<16x128xf32>
    %c0_6 = arith.constant 0 : index
    %c0_7 = arith.constant 0 : index
    %8 = vector.load %arg4[%c0_6, %c0_7] : memref<128x128xf32, #tpu.memory_space<vmem>>, vector<128x128xf32>
    %cst_8 = arith.constant dense<0.000000e+00> : vector<16x128xf32>
    %9 = tpu.matmul %7, %8, %cst_8 {dimension_numbers = #tpu.dot_dimension_numbers<[1], [0], [0], [1], [0, 0, 1, 1], [], []>} : vector<16x128xf32>, vector<128x128xf32>, vector<16x128xf32> -> vector<16x128xf32>
    %c0_9 = arith.constant 0 : index
    %c0_10 = arith.constant 0 : index
    %10 = vector.load %arg5[%c0_9, %c0_10] : memref<1x128xf32, #tpu.memory_space<vmem>>, vector<1x128xf32>
    %11 = vector.broadcast %10 : vector<1x128xf32> to vector<16x128xf32>
    %12 = arith.addf %9, %11 : vector<16x128xf32>
    %cst_11 = arith.constant 0.000000e+00 : f32
    %13 = vector.broadcast %cst_11 : f32 to vector<16x128xf32>
    %14 = arith.maximumf %12, %13 : vector<16x128xf32>
    %c0_12 = arith.constant 0 : index
    %c0_13 = arith.constant 0 : index
    %15 = vector.load %arg6[%c0_12, %c0_13] : memref<128x128xf32, #tpu.memory_space<vmem>>, vector<128x128xf32>
    %cst_14 = arith.constant dense<0.000000e+00> : vector<16x128xf32>
    %16 = tpu.matmul %14, %15, %cst_14 {dimension_numbers = #tpu.dot_dimension_numbers<[1], [0], [0], [1], [0, 0, 1, 1], [], []>} : vector<16x128xf32>, vector<128x128xf32>, vector<16x128xf32> -> vector<16x128xf32>
    %c0_15 = arith.constant 0 : index
    %c0_16 = arith.constant 0 : index
    %17 = vector.load %arg7[%c0_15, %c0_16] : memref<1x128xf32, #tpu.memory_space<vmem>>, vector<1x128xf32>
    %18 = vector.broadcast %17 : vector<1x128xf32> to vector<16x128xf32>
    %19 = arith.addf %16, %18 : vector<16x128xf32>
    %c0_17 = arith.constant 0 : index
    %c0_18 = arith.constant 0 : index
    %20 = vector.load %arg8[%c0_17, %c0_18] : memref<16x128xf32, #tpu.memory_space<vmem>>, vector<16x128xf32>
    tpu.vector_store %arg8[%c0_17, %c0_18], %19 {strides = array<i32>} : memref<16x128xf32, #tpu.memory_space<vmem>>, vector<16x128xf32>,
    return
  }
  func.func @transform_0(%arg0: i32) -> (i32, i32) {
    %c0_i32 = arith.constant 0 : i32
    %c0_i32_0 = arith.constant 0 : i32
    return %arg0, %c0_i32 : i32, i32
  }
  func.func @transform_1(%arg0: i32) -> (i32, i32) {
    %c0_i32 = arith.constant 0 : i32
    %c0_i32_0 = arith.constant 0 : i32
    %c0_i32_1 = arith.constant 0 : i32
    return %c0_i32, %c0_i32_0 : i32, i32
  }
  func.func @transform_2(%arg0: i32) -> (i32, i32) {
    %c0_i32 = arith.constant 0 : i32
    %c0_i32_0 = arith.constant 0 : i32
    %c0_i32_1 = arith.constant 0 : i32
    return %c0_i32, %c0_i32_0 : i32, i32
  }
  func.func @transform_3(%arg0: i32) -> (i32, i32) {
    %c0_i32 = arith.constant 0 : i32
    %c0_i32_0 = arith.constant 0 : i32
    %c0_i32_1 = arith.constant 0 : i32
    return %c0_i32, %c0_i32_0 : i32, i32
  }
  func.func @transform_4(%arg0: i32) -> (i32, i32) {
    %c0_i32 = arith.constant 0 : i32
    %c0_i32_0 = arith.constant 0 : i32
    %c0_i32_1 = arith.constant 0 : i32
    return %c0_i32, %c0_i32_0 : i32, i32
  }
  func.func @transform_5(%arg0: i32) -> (i32, i32) {
    %c0_i32 = arith.constant 0 : i32
    %c0_i32_0 = arith.constant 0 : i32
    %c0_i32_1 = arith.constant 0 : i32
    return %c0_i32, %c0_i32_0 : i32, i32
  }
  func.func @transform_6(%arg0: i32) -> (i32, i32) {
    %c0_i32 = arith.constant 0 : i32
    %c0_i32_0 = arith.constant 0 : i32
    %c0_i32_1 = arith.constant 0 : i32
    return %c0_i32, %c0_i32_0 : i32, i32
  }
  func.func @transform_7(%arg0: i32) -> (i32, i32) {
    %c0_i32 = arith.constant 0 : i32
    %c0_i32_0 = arith.constant 0 : i32
    return %arg0, %c0_i32 : i32, i32
  }
}

</mosaic_0001>

<bundles_post_ra>
// kernel: tpu_custom_call.1
= control target key start
LH: loop header
LB: loop body
LE: loop exit
PB: predicated region body
PF: predicated region fallthrough
CT: control target
= control target key end

     0   :  { %s1478_s0 = inlined_call_operand.hbm [shape: f32[24,32], index: 0, kind: input, shape index: {}]   ;;  %s1479_s1 = inlined_call_operand.hbm [shape: f32[32,128], index: 1, kind: input, shape index: {}]   ;;  %s1480_s2 = inlined_call_operand.vmem [shape: f32[1,128], index: 2, kind: input, shape index: {}]   ;;  %s1481_s3 = inlined_call_operand.hbm [shape: f32[128,128], index: 3, kind: input, shape index: {}]   ;;  %s1482_s4 = inlined_call_operand.vmem [shape: f32[1,128], index: 4, kind: input, shape index: {}]   ;;  %s1483_s5 = inlined_call_operand.hbm [shape: f32[128,128], index: 5, kind: input, shape index: {}]   ;;  %s1484_s6 = inlined_call_operand.vmem [shape: f32[1,128], index: 6, kind: input, shape index: {}]   ;;  %s1485_s7 = inlined_call_operand.hbm [shape: f32[24,128], index: 7, kind: output, shape index: {}]  }
   0x1   :  { %1488 = sst [smem:[#allocation15_spill]] %s1479_s1 }
   0x2   :  { %1489 = sst [smem:[#allocation16_spill]] %s1481_s3 }
   0x3   :  { %12 = vsyncpa [#allocation3], 0 }
   0x4   :  { %14 = vsyncpa [#allocation3 + $0x1], 0 }
   0x5   :  { %15 = vsyncpa [#allocation6], 0 }
   0x6   :  { %16 = vsyncpa [#allocation9], 0 }
   0x7   :  { %17 = vsyncpa [#allocation4], 0 }
   0x8   :  { %19 = vsyncpa [#allocation4 + $0x1], 0  ;;  %s1239_s24 = smov 0   ;;  %s1241_s25 = smov 0  }
   0x9   :  { %s1243_s26 = smov 0   ;;  %s1245_s27 = smov 0  }
   0xa LB: > { %s1260_s28 = sadd.s32 4294967295, %s1186_s27   ;;  %s776_s29 = sadd.s32 4294967294, %s1186_s27   ;;  %s1186_s27 = sphi %s1245_s27, %s1508_s27   ;;  %s1182_s26 = sphi %s1243_s26, %s1507_s26   ;;  %s1178_s25 = sphi %s1241_s25, %s1506_s25   ;;  %s1174_s24 = sphi %s1239_s24, %s1505_s24  }
   0xb   : > { %s1264_s30 = sadd.s32 1, %s1186_s27   ;;  %s32_s8 = sadd.s32 1, %s1182_s26 }
   0xc   : > { %s29_s9 = ssub.s32 %s1186_s27, %s1264_s30  ;;  %p39_p0 = scmp.ne.s32.totalorder %s1182_s26, %s1178_s25 }
   0xd   : > { %p30_p1 = scmp.eq.s32.totalorder %s29_s9, 0  ;;  %p40_p2 = scmp.eq.s32.totalorder %s1186_s27, 0 }
   0xe   : > { %p45_p3 = scmp.ne.s32.totalorder %s1178_s25, %s1174_s24  ;;  %p1486_p4 = scmp.eq.s32.totalorder %s1260_s28, 0 }
   0xf   : > { %s1276_s10 = scalar_select %p30_p1, %s1182_s26, %s32_s8  }
  0x10   : > { %p1278_p5 = por %p40_p2, %p39_p0  ;;  %p1284_p6 = por %p1486_p4, %p45_p3 }
  0x11   : > { %p195_p7 = scmp.eq.s32.totalorder %s1260_s28, 1  ;;  %p201_p8 = scmp.eq.s32.totalorder %s776_s29, 1 }
  0x12   : > { %s1491_s12 = scalar_select %p1284_p6, 1, 0 }
  0x13   : > { %p777_p9 = scmp.ge.s32.totalorder %s1186_s27, 1  ;;  %p208_p10 = scmp.lt.s32.totalorder %s1186_s27, 3 }
  0x14   : > { %p1291_p11 = por %p195_p7, %p39_p0  ;;  %p1295_p12 = por %p201_p8, %p45_p3 }
  0x15   : > { %p1299_p13 = pnand %p777_p9, %p208_p10  ;;  %s1188_s16 = smov [#allocation5]  }
  0x16   : > { %s1492_s13 = scalar_select %p1291_p11, 1, 0 }
  0x17   : > { %s1493_s14 = scalar_select %p1295_p12, 1, 0 }
  0x18   : > { %p948_p1 = pneg %p1299_p13  ;;  %s220_s17 = sshll.u32 %s1188_s16, 4  ;;  %s221_s17 = int_to_ptr.vmem [resolvable:$true] %s220_s17 }
  0x19   : > { %s1189_s19 = smov [#allocation7]   ;;  %s1021_s21 = scalar_lea.vmem %s221_s17, 512 }
  0x1a   : > { %p1307_p2 = pnand %p948_p1, %p1486_p4  ;;  %s236_s20 = sshll.u32 %s1189_s19, 4  ;;  %s237_s20 = int_to_ptr.vmem [resolvable:$true] %s236_s20 }
  0x1b   : > { %p1022_p3 = scmp.ne.s32.totalorder %s221_s17, %s1021_s21  ;;  %p1029_p9 = scmp.lt.s32.totalorder %s221_s17, %s221_s17 }
  0x1c   : > { %p1012_p0 = pneg %p1307_p2  ;;  %p1030_p10 = scmp.lt.s32.totalorder %s1021_s21, %s1021_s21 }
  0x1e   : > { %p1024_p7 = pnand %p1022_p3, %p1012_p0  ;;  %p1031_p12 = por %p1030_p10, %p1029_p9 }
  0x20   : > { %p1025_p8 = pneg %p1024_p7 }
  0x22   : > { %p1032_p1 = pnand %p1031_p12, %p1025_p8 }
  0x24   : > { %1035 = shalt.err (!%p1032_p1)
}
  0x25   : > { %s1190_s22 = smov 128   ;;  %s1191_s23 = smov 8  }
  0x26   : > { %s1496_s1 = sld [smem:[#allocation15_spill]]  ;;  %s1047_s9 = scalar_lea.vmem %s237_s20, 2048 }
  0x27   : > { %p1048_p4 = scmp.ne.s32.totalorder %s237_s20, %s1047_s9  ;;  %p1055_p11 = scmp.lt.s32.totalorder %s237_s20, %s237_s20 }
  0x28   : > { %p1056_p6 = scmp.lt.s32.totalorder %s1047_s9, %s1047_s9 }
  0x29   : > { %p1050_p3 = pnand %p1048_p4, %p1012_p0 }
  0x2a   : > { %p1057_p9 = por %p1056_p6, %p1055_p11 }
  0x2b   : > { %p1051_p7 = pneg %p1050_p3 }
  0x2c   : > { %951 = dma.hbm_to_vmem [thread:$0]  (!%p1307_p2), %s1496_s1, 512, %s221_s17, [#allocation6], %s1190_s22, %s1190_s22, %s1191_s23  }
  0x2d   : > { %p1058_p12 = pnand %p1057_p9, %p1051_p7 }
  0x2f   : > { %1061 = shalt.err (!%p1058_p12)
}
  0x30   : > { %s1497_s3 = sld [smem:[#allocation16_spill]]  ;;  %s1192_s21 = smov [#allocation8]  }
  0x31   : > { %s252_s17 = sshll.u32 %s1192_s21, 4  ;;  %s253_s17 = int_to_ptr.vmem [resolvable:$true] %s252_s17 }
  0x32   : > { %s1073_s29 = scalar_lea.vmem %s253_s17, 2048  ;;  %p1081_p1 = scmp.lt.s32.totalorder %s253_s17, %s253_s17 }
  0x33   : > { %p1074_p8 = scmp.ne.s32.totalorder %s253_s17, %s1073_s29  ;;  %p1082_p6 = scmp.lt.s32.totalorder %s1073_s29, %s1073_s29 }
  0x35   : > { %p1076_p4 = pnand %p1074_p8, %p1012_p0  ;;  %p1083_p11 = por %p1082_p6, %p1081_p1 }
  0x36   : > { %954 = dma.hbm_to_vmem [thread:$0]  (!%p1307_p2), %s1497_s3, 2048, %s237_s20, [#allocation6], %s1190_s22, %s1190_s22, %s1191_s23  }
  0x37   : > { %p1077_p10 = pneg %p1076_p4 }
  0x39   : > { %p1084_p3 = pnand %p1083_p11, %p1077_p10 }
  0x3b   : > { %1087 = shalt.err (!%p1084_p3)
}
  0x3c   : > { %957 = dma.hbm_to_vmem [thread:$0]  (!%p1307_p2), %s1483_s5, 2048, %s253_s17, [#allocation9], %s1190_s22, %s1190_s22, %s1191_s23  }
  0x3d   : > { %p781_p7 = scmp.ge.s32.totalorder %s1186_s27, 2 }
  0x3f   : > { %265 = sbr.rel (%p781_p7) target bundleno = 100 (0x64), region = 40 }
  0x44   : > { %268 = sbr.rel (!%p1278_p5) target bundleno = 100 (0x64), region = 44  ;;  %s269_s20 = sand.u32 (%p1278_p5), 1, %s1182_s26  }
  0x45   : > { %s783_s16 = sshll.u32 (%p1278_p5), %s1186_s27, 1  ;;  %s782_s19 = sshll.u32 (%p1278_p5), %s269_s20, 4 }
  0x46   : > { %s275_s21 = ssub.s32 (%p1278_p5), 3, %s783_s16  ;;  %s1347_s23 = scalar_lea.sflag (%p1278_p5), [#allocation3], %s269_s20 }
  0x47   : > { %p276_p0 = scmp.lt.s32.totalorder (%p1278_p5), %s275_s21, 2  ;;  %s273_s17 = scalar_lea.vmem (%p1278_p5), [#allocation2], %s782_s19 }
  0x49   : > { %s1510_s21 = smov (!%p276_p0, %s275_s21), 2 }
  0x4a   : > { %s1344_s18 = sshll.u32 %s1510_s21, 7 }
  0x4b   : > { %s280_s22 = ssub.s32 256, %s1344_s18 }
  0x4c   : > { %281 = vsyncadd %s1347_s23, %s280_s22  ;;  %p785_p5 = scmp.ne.s32.totalorder %s1344_s18, 0  ;;  %s809_s11 = sshll.u32 %s1186_s27, 8 }
  0x4d   : > { %s1355_s9 = scalar_lea.hbm %s1478_s0, %s809_s11  ;;  %s286_s16 = sshll.u32 %s273_s17, 4  ;;  %s1357_s16 = int_to_ptr.vmem [resolvable:$true] %s286_s16 }
  0x4e   : > { %s1088_s20 = scalar_lea.hbm %s1355_s9, %s1344_s18  ;;  %s1092_s22 = scalar_lea.hbm %s1478_s0, 384 }
  0x4f   : > { %p1089_p2 = scmp.ne.s32.totalorder %s1355_s9, %s1088_s20  ;;  %p1093_p8 = scmp.lt.s32.totalorder %s1355_s9, %s1478_s0 }
  0x50   : > { %p1094_p4 = scmp.lt.s32.totalorder %s1092_s22, %s1088_s20 }
  0x51   : > { %p1090_p9 = pnand %p1089_p2, %p785_p5 }
  0x52   : > { %p1095_p10 = por %p1094_p4, %p1093_p8 }
  0x53   : > { %p1091_p12 = pneg %p1090_p9 }
  0x55   : > { %p1096_p1 = pnand %p1095_p10, %p1091_p12 }
  0x57   : > { %1099 = shalt.err (!%p1096_p1)
}
  0x58   : > { %s1100_s17 = scalar_lea.vmem %s1357_s16, %s1344_s18  ;;  %s1193_s11 = smov [#allocation2]  }
  0x59   : > { %p1101_p6 = scmp.ne.s32.totalorder %s1357_s16, %s1100_s17  ;;  %s1104_s29 = sshll.u32 %s1193_s11, 4  ;;  %s1105_s29 = int_to_ptr.vmem [resolvable:$false] %s1104_s29 }
  0x5a   : > { %s1106_s8 = scalar_lea.vmem %s1105_s29, 512  ;;  %p1107_p0 = scmp.lt.s32.totalorder %s1357_s16, %s1105_s29 }
  0x5b   : > { %p1102_p11 = pnand %p1101_p6, %p785_p5  ;;  %p1108_p2 = scmp.lt.s32.totalorder %s1106_s8, %s1100_s17 }
  0x5d   : > { %p1103_p3 = pneg %p1102_p11  ;;  %p1109_p9 = por %p1108_p2, %p1107_p0 }
  0x5f   : > { %p1110_p8 = pnand %p1109_p9, %p1103_p3 }
  0x61   : > { %1113 = shalt.err (!%p1110_p8)
}
  0x62   : > { %s1194_s1 = smov 128   ;;  %s1195_s3 = smov 8  }
  0x63   : > { %292 = dma.hbm_to_vmem [thread:$0]  (%p785_p5), %s1355_s9, %s1344_s18, %s1357_s16, %s1347_s23, %s1194_s1, %s1194_s1, %s1195_s3  }
  0x64 PF: > { %298 = sbr.rel (%p1299_p13) target bundleno = 746 (0x2ea), region = 48  ;;  %s1386_s20 = sand.u32 (!%p1299_p13), 1, %s1178_s25  }
  0x65   : > { %s790_s19 = sshll.u32 (!%p1299_p13), %s1386_s20, 4  ;;  %s301_s21 = scalar_lea.sflag (!%p1299_p13), [#allocation3], %s1386_s20 }
  0x66   : > { %s304_s22 = scalar_lea.vmem (!%p1299_p13), [#allocation2], %s790_s19  ;;  %p1498_p12 = scmp.ne.s32.totalorder (!%p1299_p13), %s1491_s12, 0 }
  0x69   : > { %1157 = dma.done.wait (%p1498_p12), %s301_s21, 256  }
  0x6a   : > { %1159 = vsyncadd (%p1498_p12), %s301_s21, 4294967040  ;;  %p1499_p5 = scmp.eq.s32.totalorder %s1260_s28, 0 }
  0x6c   : > { %1161 = dma.done.wait (%p1499_p5), [#allocation6], 2560   ;;  %p1500_p13 = pmov %p1499_p5 }
  0x6d   : > { %p1501_p4 = pmov %p1499_p5 }
  0x6e   : > { %1163 = vsyncadd (%p1500_p13), [#allocation6], 4294964736 }
  0x6f   : > { %1165 = dma.done.wait (%p1501_p4), [#allocation9], 2048   ;;  %p1502_p10 = pmov %p1501_p4 }
  0x70   : > { %vm370_vm0 = vcmask 261120   ;;  %v362_v0 = vld [vmem:[#allocation5 + $0x18] sm:$0xff]  ;;  %v361_v1 = vld [vmem:[#allocation5 + $0x10] sm:$0xff]  ;;  %v360_v3 = vld [vmem:[#allocation5 + $0x8] sm:$0xff]  ;;  %s346_s17 = scalar_lea.vmem [#allocation10], %s790_s19  ;;  %s655_s11 = scalar_lea.sflag [#allocation4], %s1386_s20 }
  0x71   : > { %1167 = vsyncadd (%p1502_p10), [#allocation9], 4294965248  ;;  %853 = vmatprep.subr.mxu0 %v362_v0  ;;  %v357_v2 = vld [vmem:[%s304_s22] sm:$0xff]  ;;  %v469_v4 = vld [vmem:[#allocation7 + $0x78] sm:$0xff]  ;;  %p1503_p1 = scmp.ne.s32.totalorder %s1492_s13, 0 }
  0x72   : > { %854 = vmatpush3.msra.mxu0 %v362_v0  ;;  %861 = vmatprep.mubr.msk.f32.mxu0 %vm370_vm0, %v357_v2  ;;  %v468_v5 = vld [vmem:[#allocation7 + $0x70] sm:$0xff]  ;;  %v359_v6 = vld [vmem:[#allocation5] sm:$0xff]  ;;  %v467_v7 = vld [vmem:[#allocation7 + $0x68] sm:$0xff]  ;;  %s801_s29 = sshll.u32 (%p1503_p1), %s1260_s28, 1 }
  0x73   : > { %855 = vmatprep.subr.mxu0 %v361_v1  ;;  %864 = vmatprep.subr.mxu1 %v469_v4  ;;  %v358_v8 = vld [vmem:[%s304_s22 + $0x8] sm:$0xff]  ;;  %v466_v9 = vld [vmem:[#allocation7 + $0x60] sm:$0xff]  ;;  %v464_v11 = vld [vmem:[#allocation7 + $0x50] sm:$0xff]  ;;  %s663_s8 = ssub.s32 (%p1503_p1), 3, %s801_s29 }
  0x74   : > { %856 = vmatpush3.msra.mxu0 %v361_v1  ;;  %865 = vmatpush3.msra.mxu1 %v469_v4  ;;  %v465_v10 = vld [vmem:[#allocation7 + $0x58] sm:$0xff]  ;;  %v463_v12 = vld [vmem:[#allocation7 + $0x48] sm:$0xff]  ;;  %v462_v13 = vld [vmem:[#allocation7 + $0x40] sm:$0xff]  ;;  %p664_p6 = scmp.lt.s32.totalorder (%p1503_p1), %s663_s8, 2 }
  0x75   : > { %857 = vmatprep.subr.mxu0 %v360_v3  ;;  %866 = vmatprep.subr.mxu1 %v468_v5  ;;  %v461_v14 = vld [vmem:[#allocation7 + $0x38] sm:$0xff]  ;;  %v460_v15 = vld [vmem:[#allocation7 + $0x30] sm:$0xff]  ;;  %v459_v16 = vld [vmem:[#allocation7 + $0x28] sm:$0xff] }
  0x76   : > { %858 = vmatpush3.msra.mxu0 %v360_v3  ;;  %867 = vmatpush3.msra.mxu1 %v468_v5  ;;  %v458_v17 = vld [vmem:[#allocation7 + $0x20] sm:$0xff]  ;;  %v457_v18 = vld [vmem:[#allocation7 + $0x18] sm:$0xff]  ;;  %v456_v19 = vld [vmem:[#allocation7 + $0x10] sm:$0xff] }
  0x77   : > { %859 = vmatprep.subr.mxu0 %v359_v6  ;;  %868 = vmatprep.subr.mxu1 %v467_v7  ;;  %v455_v20 = vld [vmem:[#allocation7 + $0x8] sm:$0xff]  ;;  %v454_v21 = vld [vmem:[#allocation7] sm:$0xff]  ;;  %v569_v22 = vld [vmem:[#allocation8 + $0x78] sm:$0xff] }
  0x78   : > { %860 = vmatpush3.msra.mxu0 %v359_v6  ;;  %869 = vmatpush3.msra.mxu1 %v467_v7  ;;  %v568_v23 = vld [vmem:[#allocation8 + $0x70] sm:$0xff]  ;;  %v567_v24 = vld [vmem:[#allocation8 + $0x68] sm:$0xff]  ;;  %v566_v25 = vld [vmem:[#allocation8 + $0x60] sm:$0xff] }
  0x79   : > { %862 = vmatmul.mubr.msk.f32.vlgmr.msra.gmra.mxu0 %vm370_vm0, %v358_v8  ;;  %870 = vmatprep.subr.mxu1 %v466_v9  ;;  %v565_v26 = vld [vmem:[#allocation8 + $0x58] sm:$0xff]  ;;  %v564_v27 = vld [vmem:[#allocation8 + $0x50] sm:$0xff]  ;;  %v563_v28 = vld [vmem:[#allocation8 + $0x48] sm:$0xff] }
  0x7a   : > { %871 = vmatpush3.msra.mxu1 %v466_v9  ;;  %899 = vmatprep.subr.mxu0 %v569_v22  ;;  %v562_v29 = vld [vmem:[#allocation8 + $0x40] sm:$0xff]  ;;  %v561_v30 = vld [vmem:[#allocation8 + $0x38] sm:$0xff]  ;;  %v560_v31 = vld [vmem:[#allocation8 + $0x30] sm:$0xff] }
  0x7b   : > { %872 = vmatprep.subr.mxu1 %v465_v10  ;;  %900 = vmatpush3.msra.mxu0 %v569_v22  ;;  %v559_v32 = vld [vmem:[#allocation8 + $0x28] sm:$0xff]  ;;  %v558_v33 = vld [vmem:[#allocation8 + $0x20] sm:$0xff]  ;;  %v557_v41 = vld [vmem:[#allocation8 + $0x18] sm:$0xff] }
  0x7c   : > { %873 = vmatpush3.msra.mxu1 %v465_v10  ;;  %901 = vmatprep.subr.mxu0 %v568_v23  ;;  %v795_v34 = vld [vmem:[%s1480_s2] ss:$0 sm:$0xff]  ;;  %v556_v42 = vld [vmem:[#allocation8 + $0x10] sm:$0xff]  ;;  %v555_v43 = vld [vmem:[#allocation8 + $0x8] sm:$0xff] }
  0x7d   : > { %874 = vmatprep.subr.mxu1 %v464_v11  ;;  %902 = vmatpush3.msra.mxu0 %v568_v23  ;;  %v554_v44 = vld [vmem:[#allocation8] sm:$0xff] }
  0x7e   : > { %875 = vmatpush3.msra.mxu1 %v464_v11  ;;  %903 = vmatprep.subr.mxu0 %v567_v24  ;;  %v798_v45 = vld [vmem:[%s1482_s4] ss:$0 sm:$0xff] }
  0x7f   : > { %876 = vmatprep.subr.mxu1 %v463_v12  ;;  %904 = vmatpush3.msra.mxu0 %v567_v24  ;;  %v799_v52 = vld [vmem:[%s1484_s6] ss:$0 sm:$0xff] }
  0x80   : > { %877 = vmatpush3.msra.mxu1 %v463_v12  ;;  %905 = vmatprep.subr.mxu0 %v566_v25 }
  0x81   : > { %878 = vmatprep.subr.mxu1 %v462_v13  ;;  %906 = vmatpush3.msra.mxu0 %v566_v25 }
  0x82   : > { %879 = vmatpush3.msra.mxu1 %v462_v13  ;;  %907 = vmatprep.subr.mxu0 %v565_v26 }
  0x83   : > { %880 = vmatprep.subr.mxu1 %v461_v14  ;;  %908 = vmatpush3.msra.mxu0 %v565_v26 }
  0x84   : > { %881 = vmatpush3.msra.mxu1 %v461_v14  ;;  %909 = vmatprep.subr.mxu0 %v564_v27 }
  0x85   : > { %882 = vmatprep.subr.mxu1 %v460_v15  ;;  %910 = vmatpush3.msra.mxu0 %v564_v27 }
  0x86   : > { %883 = vmatpush3.msra.mxu1 %v460_v15  ;;  %911 = vmatprep.subr.mxu0 %v563_v28 }
  0x87   : > { %884 = vmatprep.subr.mxu1 %v459_v16  ;;  %912 = vmatpush3.msra.mxu0 %v563_v28 }
  0x88   : > { %885 = vmatpush3.msra.mxu1 %v459_v16  ;;  %913 = vmatprep.subr.mxu0 %v562_v29 }
  0x89   : > { %886 = vmatprep.subr.mxu1 %v458_v17  ;;  %914 = vmatpush3.msra.mxu0 %v562_v29 }
  0x8a   : > { %887 = vmatpush3.msra.mxu1 %v458_v17  ;;  %915 = vmatprep.subr.mxu0 %v561_v30 }
  0x8b   : > { %888 = vmatprep.subr.mxu1 %v457_v18  ;;  %916 = vmatpush3.msra.mxu0 %v561_v30 }
  0x8c   : > { %889 = vmatpush3.msra.mxu1 %v457_v18  ;;  %917 = vmatprep.subr.mxu0 %v560_v31 }
  0x8d   : > { %890 = vmatprep.subr.mxu1 %v456_v19  ;;  %918 = vmatpush3.msra.mxu0 %v560_v31 }
  0x8e   : > { %891 = vmatpush3.msra.mxu1 %v456_v19  ;;  %919 = vmatprep.subr.mxu0 %v559_v32 }
  0x8f   : > { %892 = vmatprep.subr.mxu1 %v455_v20  ;;  %920 = vmatpush3.msra.mxu0 %v559_v32 }
  0x90   : > { %893 = vmatpush3.msra.mxu1 %v455_v20  ;;  %921 = vmatprep.subr.mxu0 %v558_v33 }
  0x91   : > { %894 = vmatprep.subr.mxu1 %v454_v21  ;;  %922 = vmatpush3.msra.mxu0 %v558_v33 }
  0x92   : > { %895 = vmatpush3.msra.mxu1 %v454_v21  ;;  %923 = vmatprep.subr.mxu0 %v557_v41 }
  0x93   : > { %924 = vmatpush3.msra.mxu0 %v557_v41 }
  0x94   : > { %925 = vmatprep.subr.mxu0 %v556_v42 }
  0x95   : > { %926 = vmatpush3.msra.mxu0 %v556_v42 }
  0x96   : > { %927 = vmatprep.subr.mxu0 %v555_v43 }
  0x97   : > { %928 = vmatpush3.msra.mxu0 %v555_v43 }
  0x98   : > { %929 = vmatprep.subr.mxu0 %v554_v44 }
  0x99   : > { %930 = vmatpush3.msra.mxu0 %v554_v44 }
 0x139   : > { %v863_v35 = vpop.f32.mrf.mxu0 }
 0x13a   : > { %v449_v36 = vadd.f32 %v863_v35, %v795_v34 }
 0x13b   : > { %v443_v37 = vpop.f32.mrf.mxu0 }
 0x13c   : > { %v444_v38 = vadd.f32 %v795_v34, %v443_v37  ;;  %v453_v40 = vmax.f32 %v449_v36, 0.0 }
 0x13e   : > { %v452_v39 = vmax.f32 %v444_v38, 0.0 }
 0x140   : > { %896 = vmatprep.mubr.f32.mxu1 %v452_v39 }
 0x141   : > { %897 = vmatmul.mubr.f32.vlgmr.msra.gmra.mxu1 %v453_v40 }
 0x201   : > { %v898_v46 = vpop.f32.mrf.mxu1 }
 0x202   : > { %v549_v47 = vadd.f32 %v898_v46, %v798_v45 }
 0x203   : > { %v543_v48 = vpop.f32.mrf.mxu1 }
 0x204   : > { %v544_v49 = vadd.f32 %v798_v45, %v543_v48  ;;  %v553_v51 = vmax.f32 %v549_v47, 0.0 }
 0x206   : > { %v552_v50 = vmax.f32 %v544_v49, 0.0 }
 0x208   : > { %931 = vmatprep.mubr.f32.mxu0 %v552_v50 }
 0x209   : > { %932 = vmatmul.mubr.f32.vlgmr.msra.gmra.mxu0 %v553_v51 }
 0x2c9   : > { %v933_v53 = vpop.f32.mrf.mxu0 }
 0x2ca   : > { %v649_v54 = vadd.f32 %v933_v53, %v799_v52  ;;  %661 = sbr.rel (!%p1503_p1) target bundleno = 746 (0x2ea), region = 68 }
 0x2cb   : > { %v643_v55 = vpop.f32.mrf.mxu0 }
 0x2cc   : > { %653 = vst [vmem:[%s346_s17 + $0x8] sm:$0xff] %v649_v54  ;;  %v644_v56 = vadd.f32 %v799_v52, %v643_v55 }
 0x2ce   : > { %652 = vst [vmem:[%s346_s17] sm:$0xff] %v644_v56 }
 0x2cf   : > { %s1512_s8 = smov (!%p664_p6, %s663_s8), 2 }
 0x2d0   : > { %s1421_s1 = sshll.u32 %s1512_s8, 7 }
 0x2d1   : > { %s668_s3 = ssub.s32 256, %s1421_s1 }
 0x2d2   : > { %669 = vsyncadd %s655_s11, %s668_s3  ;;  %p803_p11 = scmp.ne.s32.totalorder %s1421_s1, 0  ;;  %s810_s19 = sshll.u32 %s1260_s28, 8 }
 0x2d3   : > { %s1431_s22 = scalar_lea.hbm %s1485_s7, %s810_s19  ;;  %s674_s12 = sshll.u32 %s346_s17, 4  ;;  %s1433_s12 = int_to_ptr.vmem [resolvable:$true] %s674_s12 }
 0x2d4   : > { %s1114_s15 = scalar_lea.vmem %s1433_s12, %s1421_s1  ;;  %s1196_s18 = smov [#allocation10]  }
 0x2d5   : > { %p1115_p3 = scmp.ne.s32.totalorder %s1433_s12, %s1114_s15  ;;  %s1118_s23 = sshll.u32 %s1196_s18, 4  ;;  %s1119_s23 = int_to_ptr.vmem [resolvable:$false] %s1118_s23 }
 0x2d6   : > { %s1120_s28 = scalar_lea.vmem %s1119_s23, 512  ;;  %p1121_p9 = scmp.lt.s32.totalorder %s1433_s12, %s1119_s23 }
 0x2d7   : > { %p1116_p0 = pnand %p1115_p3, %p803_p11  ;;  %p1122_p8 = scmp.lt.s32.totalorder %s1120_s28, %s1114_s15 }
 0x2d9   : > { %p1117_p2 = pneg %p1116_p0  ;;  %p1123_p12 = por %p1122_p8, %p1121_p9 }
 0x2db   : > { %p1124_p5 = pnand %p1123_p12, %p1117_p2 }
 0x2dd   : > { %1127 = shalt.err (!%p1124_p5)
}
 0x2de   : > { %s1128_s9 = scalar_lea.hbm %s1431_s22, %s1421_s1  ;;  %s1132_s29 = scalar_lea.hbm %s1485_s7, 384 }
 0x2df   : > { %p1129_p13 = scmp.ne.s32.totalorder %s1431_s22, %s1128_s9  ;;  %p1133_p1 = scmp.lt.s32.totalorder %s1431_s22, %s1485_s7 }
 0x2e0   : > { %p1134_p6 = scmp.lt.s32.totalorder %s1132_s29, %s1128_s9 }
 0x2e1   : > { %p1130_p4 = pnand %p1129_p13, %p803_p11 }
 0x2e2   : > { %p1135_p3 = por %p1134_p6, %p1133_p1 }
 0x2e3   : > { %p1131_p10 = pneg %p1130_p4 }
 0x2e5   : > { %p1136_p0 = pnand %p1135_p3, %p1131_p10 }
 0x2e7   : > { %1139 = shalt.err (!%p1136_p0)
}
 0x2e8   : > { %s1197_s19 = smov 128   ;;  %s1198_s13 = smov 8  }
 0x2e9   : > { %680 = dma.vmem_to_hbm [thread:$0]  (%p803_p11), %s1433_s12, %s1421_s1, %s1431_s22, %s655_s11, %s1197_s19, %s1197_s19, %s1198_s13  }
 0x2ea PF: > { %s689_s21 = sand.u32 1, %s1174_s24   ;;  %p1504_p2 = scmp.ne.s32.totalorder %s1493_s14, 0 }
 0x2eb   : > { %s690_s15 = scalar_lea.sflag [#allocation4], %s689_s21 }
 0x2ec   : > { %p959_p9 = pnand %p781_p7, %p1504_p2 }
 0x2ee   : > { %p960_p8 = pneg %p959_p9 }
 0x2f0   : > { %1169 = dma.done.wait (%p960_p8), %s690_s15, 256  }
 0x2f1   : > { %1171 = vsyncadd (%p960_p8), %s690_s15, 4294967040  ;;  %p22_p12 = scmp.ge.s32.totalorder %s1264_s30, 4   ;;  %s1505_s24 = smov %s1178_s25 }
 0x2f2   : > { %s1506_s25 = smov %s1182_s26  ;;  %s1507_s26 = smov %s1276_s10 }
 0x2f3   : > { %s1508_s27 = smov %s1264_s30  ;;  %24 = sbr.rel (!%p22_p12) target bundleno = 10 (0xa), region = 105 }
 0x2f8   :  { %695 = vsyncpa [#allocation3], 1 }
 0x2f9   :  { %697 = vsyncpa [#allocation3 + $0x1], 1 }
 0x2fa   :  { %698 = vsyncpa [#allocation6], 1 }
 0x2fb   :  { %699 = vsyncpa [#allocation9], 1 }
 0x2fc   :  { %700 = vsyncpa [#allocation4], 1 }
 0x2fd   :  { %702 = vsyncpa [#allocation4 + $0x1], 1 }

</bundles_post_ra>
